<compile_context>
chip_gen: v7x
topology: tpu7x:2x2x1
jax: 0.10.0
libtpu: 0.0.40
codegen_flags: <defaults>
</compile_context>

<pallas_src>
import numpy as np
import jax
import jax.numpy as jnp
from jax.experimental import pallas as pl
from jax.experimental.pallas import tpu as pltpu


# -----------------------------------------------------------------------------
# Kernels
# -----------------------------------------------------------------------------
def _leaky(v, slope=0.01):
    # F.leaky_relu default negative_slope = 0.01
    return jnp.where(v >= 0, v, slope * v)


def linear_kernel(x_ref, w_ref, b_ref, h_ref):
    # h = x @ (W * scale) + (b * scale)   (scale folded into W, b by wrapper)
    h_ref[...] = jnp.dot(x_ref[...], w_ref[...],
                         preferred_element_type=jnp.float32) + b_ref[...]


def debias_kernel(scal_ref,                       # SMEM (2,): [omega, K_thresh]
                  adj_ref,                        # (TM, TK) bf16 adjacency tile
                  hk_ref,                         # (TK, Fp) h streamed along K
                  hr_ref,                         # (TM, Fp) h for this row tile
                  mdv_ref,                        # (TM, dim_M) PE[degree]
                  deg_ref,                        # (TM, 1)   float degree
                  wgb_ref,                        # (dim_M, 2*Fp)  W_gamma | W_beta
                  bgb_ref,                        # (1, 2*Fp)      b_gamma | b_beta
                  war_ref,                        # (Fp, 2*Fp)     W_add   | W_rev
                  out_ref,                        # (TM, Fp)
                  loss_ref,                       # (TM, 2)  per-row [L_b, L_film]
                  acc_ref):                       # VMEM scratch (TM, Fp) f32
    k_step = pl.program_id(1)

    @pl.when(k_step == 0)
    def _init():
        acc_ref[...] = jnp.zeros_like(acc_ref)

    # adj streamed as bf16 (exact for 0/1), accumulate adj @ h in f32.
    acc_ref[...] += jnp.dot(adj_ref[...].astype(jnp.float32), hk_ref[...],
                            preferred_element_type=jnp.float32)

    @pl.when(k_step == pl.num_programs(1) - 1)
    def _finalize():
        omega = scal_ref[0]
        k_thr = scal_ref[1]                      # mean(degree) * k, hoisted
        fp = out_ref.shape[-1]

        aggr = acc_ref[...]
        h = hr_ref[...]
        deg = deg_ref[...]

        # FiLM params from the degree positional encoding (fused gamma|beta).
        gb = _leaky(jnp.dot(mdv_ref[...], wgb_ref[...],
                            preferred_element_type=jnp.float32) + bgb_ref[...])
        gamma = gb[:, :fp]
        beta = gb[:, fp:]

        # i = spmm(adj, h) / degree ; rows with degree == 0 set to 0.
        safe = jnp.where(deg == 0.0, 1.0, deg)
        i_agg = jnp.where(deg == 0.0, 0.0,
                          aggr * pl.reciprocal(safe, approx=False))

        # Fused add|rev matmul.
        ar = jnp.dot(i_agg, war_ref[...], preferred_element_type=jnp.float32)
        b_add = (gamma + 1.0) * ar[:, :fp] + beta
        b_rev = (gamma + 1.0) * ar[:, fp:] + beta

        # R gate against the hoisted threshold.
        R = jnp.where(deg < k_thr, 1.0, 0.0)

        def rownorm(m):
            return jnp.sqrt(jnp.sum(m * m, axis=1, keepdims=True))

        # Per-row loss contributions; the idx gather + mean happens in wrapper.
        lb = rownorm(R * b_add) + rownorm((1.0 - R) * b_rev)
        lf = rownorm(gamma) + rownorm(beta)
        loss_ref[...] = jnp.concatenate([lb, lf], axis=1)

        # bias + base==1 output.
        bias = omega * (R * b_add - (1.0 - R) * b_rev)
        out = (aggr + h + bias) * pl.reciprocal(deg + 1.0, approx=False)
        out_ref[...] = _leaky(out)


# -----------------------------------------------------------------------------
# Wrapper
# -----------------------------------------------------------------------------
def _round_up(a, b):
    return ((a + b - 1) // b) * b


def _pad_rows(a, n):
    return jnp.pad(a, ((0, n - a.shape[0]), (0, 0)))


def _pad_cols(a, n):
    return jnp.pad(a, ((0, 0), (0, n - a.shape[1])))


def debias_v2_forward(x, adj, degree, idx, p, *, tm=128, tk=256):
    """p: dict with parameters + config (see __main__). base==1 path only."""
    assert tk % tm == 0
    N, in_feat = x.shape
    F = p["W_lin_T"].shape[1]
    dim_M = p["PE"].shape[1]
    FP = _round_up(max(F, 128), 128)             # lane-dense feature axis
    Np = _round_up(max(N, tk), tk)               # node axis padded to tiles
    nR, nK = Np // tm, Np // tk

    scale = p["dim_M"] ** 0.5 if p["dataset"] != "nba" else 1.0

    # --- glue: gathers, padding, parameter packing (cheap, runs in XLA) ------
    m_dv = p["PE"][degree[:, 0]]                 # torch.squeeze(self.PE[degree])
    deg_f = degree.astype(jnp.float32)           # (N, 1)
    k_thr = jnp.mean(deg_f) * p["k"]             # hoisted mean(degree) * k
    scalars = jnp.stack([jnp.float32(p["omega"]), k_thr.astype(jnp.float32)])

    w_lin = _pad_cols(p["W_lin_T"] * scale, FP)  # fold the dim_M**0.5 scale in
    b_lin = _pad_cols(p["b_lin"] * scale, FP)
    w_gb = jnp.concatenate([_pad_cols(p["W_gamma"], FP),
                            _pad_cols(p["W_beta"], FP)], axis=1)
    b_gb = jnp.concatenate([_pad_cols(p["b_gamma"], FP),
                            _pad_cols(p["b_beta"], FP)], axis=1)
    w_add = _pad_cols(_pad_rows(p["W_add_T"], FP), FP)
    w_rev = _pad_cols(_pad_rows(p["W_rev_T"], FP), FP)
    w_ar = jnp.concatenate([w_add, w_rev], axis=1)          # (FP, 2*FP)

    x_p = _pad_rows(x, Np)
    adj_p = jnp.pad(adj, ((0, Np - N), (0, Np - N))).astype(jnp.bfloat16)
    mdv_p = _pad_rows(m_dv, Np)
    deg_p = _pad_rows(deg_f, Np)

    # --- kernel 1: h = self.weight(x) * scale, row-tiled ----------------------
    h = pl.pallas_call(
        linear_kernel,
        out_shape=jax.ShapeDtypeStruct((Np, FP), jnp.float32),
        grid_spec=pltpu.PrefetchScalarGridSpec(
            num_scalar_prefetch=0, grid=(nR,),
            in_specs=[pl.BlockSpec((tm, in_feat), lambda r: (r, 0)),
                      pl.BlockSpec((in_feat, FP), lambda r: (0, 0)),
                      pl.BlockSpec((1, FP), lambda r: (0, 0))],
            out_specs=pl.BlockSpec((tm, FP), lambda r: (r, 0))),
        compiler_params=pltpu.CompilerParams(
            dimension_semantics=("parallel",)),
    )(x_p, w_lin, b_lin)

    # --- kernel 2: tiled adj@h aggregation + FiLM + debias + per-row losses ---
    out_p, loss_rows = pl.pallas_call(
        debias_kernel,
        out_shape=(jax.ShapeDtypeStruct((Np, FP), jnp.float32),
                   jax.ShapeDtypeStruct((Np, 2), jnp.float32)),
        grid_spec=pltpu.PrefetchScalarGridSpec(
            num_scalar_prefetch=0, grid=(nR, nK),
            in_specs=[
                pl.BlockSpec(memory_space=pltpu.MemorySpace.SMEM),   # scalars
                pl.BlockSpec((tm, tk), lambda r, k: (r, k)),         # adj (bf16)
                pl.BlockSpec((tk, FP), lambda r, k: (k, 0)),         # h, K stream
                pl.BlockSpec((tm, FP), lambda r, k: (r, 0)),         # h, row tile
                pl.BlockSpec((tm, dim_M), lambda r, k: (r, 0)),      # m_dv
                pl.BlockSpec((tm, 1), lambda r, k: (r, 0)),          # degree
                pl.BlockSpec((dim_M, 2 * FP), lambda r, k: (0, 0)),  # W_gamma|W_beta
                pl.BlockSpec((1, 2 * FP), lambda r, k: (0, 0)),      # b_gamma|b_beta
                pl.BlockSpec((FP, 2 * FP), lambda r, k: (0, 0)),     # W_add|W_rev
            ],
            out_specs=(pl.BlockSpec((tm, FP), lambda r, k: (r, 0)),
                       pl.BlockSpec((tm, 2), lambda r, k: (r, 0))),
            scratch_shapes=[pltpu.VMEM((tm, FP), jnp.float32)]),
        compiler_params=pltpu.CompilerParams(
            dimension_semantics=("parallel", "arbitrary")),
    )(scalars, adj_p, h, h, mdv_p, deg_p, w_gb, b_gb, w_ar)

    out = out_p[:N, :F]
    n_idx = idx.shape[0]
    L_b = jnp.sum(loss_rows[idx, 0]) / n_idx
    L_f = jnp.sum(loss_rows[idx, 1]) / n_idx
    return out, L_b, L_f


# pure-JAX reference (mirrors the PyTorch forward, base==1)
def debias_v2_reference(x, adj, degree, idx, p):
    m_dv = p["PE"][degree[:, 0]]
    deg_f = degree.astype(jnp.float32)
    scale = p["dim_M"] ** 0.5 if p["dataset"] != "nba" else 1.0

    h = (x @ p["W_lin_T"] + p["b_lin"]) * scale
    gamma = _leaky(m_dv @ p["W_gamma"] + p["b_gamma"])
    beta = _leaky(m_dv @ p["W_beta"] + p["b_beta"])
    aggr = adj @ h
    i = jnp.where(deg_f == 0.0, 0.0,
                  aggr / jnp.where(deg_f == 0.0, 1.0, deg_f))
    b_add = (gamma + 1.0) * (i @ p["W_add_T"]) + beta
    b_rev = (gamma + 1.0) * (i @ p["W_rev_T"]) + beta
    K = jnp.mean(deg_f) * p["k"]
    R = jnp.where(deg_f < K, 1.0, 0.0)
    nrm = lambda m: jnp.linalg.norm(m, axis=1)
    L_b = (jnp.sum(nrm((R * b_add)[idx])) +
           jnp.sum(nrm(((1.0 - R) * b_rev)[idx]))) / idx.shape[0]
    L_f = (jnp.sum(nrm(gamma[idx])) + jnp.sum(nrm(beta[idx]))) / idx.shape[0]
    bias = p["omega"] * (R * b_add - (1.0 - R) * b_rev)
    out = (aggr + h + bias) / (deg_f + 1.0)
    return _leaky(out), L_b, L_f


# -----------------------------------------------------------------------------
# Main
# -----------------------------------------------------------------------------
if __name__ == "__main__":
    N, in_feat, out_feat, dim_M = 500, 16, 32, 16     # N not tile-aligned on purpose
    args_k, args_omega = 2.0, 0.1

    key = jax.random.PRNGKey(0)
    keys = jax.random.split(key, 12)

    # deterministic parameter init (shapes follow the module's __init__)
    W_lin = jax.random.uniform(keys[0], (out_feat, in_feat), jnp.float32, -0.2, 0.2)
    b_lin = jax.random.uniform(keys[1], (1, out_feat), jnp.float32, -0.2, 0.2)
    W_gamma = jax.random.uniform(keys[2], (dim_M, out_feat), jnp.float32)
    W_beta = jax.random.uniform(keys[3], (dim_M, out_feat), jnp.float32)
    b_gamma = jax.random.uniform(keys[4], (1, out_feat), jnp.float32)
    b_beta = jax.random.uniform(keys[5], (1, out_feat), jnp.float32)
    W_add = jax.random.uniform(keys[6], (out_feat, out_feat), jnp.float32, -0.2, 0.2)
    W_rev = jax.random.uniform(keys[7], (out_feat, out_feat), jnp.float32, -0.2, 0.2)
    # NOTE: U_gamma / U_beta exist in __init__ but are unused in forward.

    # deterministic inputs
    x = jax.random.normal(keys[8], (N, in_feat), jnp.float32)
    adj = (jax.random.uniform(keys[9], (N, N)) < 0.02).astype(jnp.float32)
    adj = adj.at[0, :].set(0.0)                       # make node 0 degree-0
    degree = jnp.sum(adj, axis=1).astype(jnp.int32).reshape(N, 1)
    d_max = int(jnp.max(degree))
    idx = jnp.array([0, 3, 7, 7, 42, 123, 250, 499], jnp.int32)  # with a duplicate

    # positional-encoding table (same formula as the module)
    pe = np.array([[pos / np.power(10000, (i - i % 2) / dim_M)
                    for i in range(dim_M)] for pos in range(d_max + 1)])
    pe[:, 0::2] = np.sin(pe[:, 0::2])
    pe[:, 1::2] = np.cos(pe[:, 1::2])
    PE = jnp.asarray(pe, jnp.float32)

    params = dict(W_lin_T=W_lin.T, b_lin=b_lin,
                  W_gamma=W_gamma, W_beta=W_beta,
                  b_gamma=b_gamma, b_beta=b_beta,
                  W_add_T=W_add.T, W_rev_T=W_rev.T,
                  PE=PE, dim_M=dim_M, k=args_k, omega=args_omega,
                  dataset="synthetic")

    out, L_b, L_film = debias_v2_forward(x, adj, degree, idx, params)
    jax.block_until_ready((out, L_b, L_film))

    ref_out, ref_Lb, ref_Lf = debias_v2_reference(x, adj, degree, idx, params)
    assert np.allclose(np.asarray(out), np.asarray(ref_out), rtol=1e-4, atol=1e-4)
    assert np.allclose(float(L_b), float(ref_Lb), rtol=1e-4, atol=1e-4)
    assert np.allclose(float(L_film), float(ref_Lf), rtol=1e-4, atol=1e-4)

    # TODO(synk): base==2 branch (torch.sparse_coo spmm attention + dropout) and
    # base==3 branch are not exercised; this kernel implements the base==1 path.
    print("KERNEL_OK")
</pallas_src>

<mosaic_0001>
module attributes {stable_mosaic.version = 11 : i64} {
  func.func @linear_kernel(%arg0: i32, %arg1: memref<128x16xf32, #tpu.memory_space<vmem>>, %arg2: memref<16x128xf32, #tpu.memory_space<vmem>>, %arg3: memref<1x128xf32, #tpu.memory_space<vmem>>, %arg4: memref<128x128xf32, #tpu.memory_space<vmem>>) attributes {dimension_semantics = [#tpu.dimension_semantics<parallel>], iteration_bounds = array<i64: 4>, scalar_prefetch = 0 : i64, scratch_operands = 0 : i64, tpu.core_type = #tpu.core_type<tc>, window_params = [{transform_indices = @transform_0, window_bounds = array<i64: 128, 16>}, {pipeline_mode = #tpu.pipeline_mode<synchronous>, transform_indices = @transform_1, window_bounds = array<i64: 16, 128>}, {pipeline_mode = #tpu.pipeline_mode<synchronous>, transform_indices = @transform_2, window_bounds = array<i64: 1, 128>}, {transform_indices = @transform_3, window_bounds = array<i64: 128, 128>}]} {
    %c0 = arith.constant 0 : index
    %c0_0 = arith.constant 0 : index
    %0 = vector.load %arg1[%c0, %c0_0] : memref<128x16xf32, #tpu.memory_space<vmem>>, vector<128x16xf32>
    %c0_1 = arith.constant 0 : index
    %c0_2 = arith.constant 0 : index
    %1 = vector.load %arg2[%c0_1, %c0_2] : memref<16x128xf32, #tpu.memory_space<vmem>>, vector<16x128xf32>
    %cst = arith.constant dense<0.000000e+00> : vector<128x128xf32>
    %2 = tpu.matmul %0, %1, %cst {dimension_numbers = #tpu.dot_dimension_numbers<[1], [0], [0], [1], [0, 0, 1, 1], [], []>} : vector<128x16xf32>, vector<16x128xf32>, vector<128x128xf32> -> vector<128x128xf32>
    %c0_3 = arith.constant 0 : index
    %c0_4 = arith.constant 0 : index
    %3 = vector.load %arg3[%c0_3, %c0_4] : memref<1x128xf32, #tpu.memory_space<vmem>>, vector<1x128xf32>
    %4 = vector.broadcast %3 : vector<1x128xf32> to vector<128x128xf32>
    %5 = arith.addf %2, %4 : vector<128x128xf32>
    %c0_5 = arith.constant 0 : index
    %c0_6 = arith.constant 0 : index
    %6 = vector.load %arg4[%c0_5, %c0_6] : memref<128x128xf32, #tpu.memory_space<vmem>>, vector<128x128xf32>
    tpu.vector_store %arg4[%c0_5, %c0_6], %5 {strides = array<i32>} : memref<128x128xf32, #tpu.memory_space<vmem>>, vector<128x128xf32>,
    return
  }
  func.func @transform_0(%arg0: i32) -> (i32, i32) {
    %c0_i32 = arith.constant 0 : i32
    %c0_i32_0 = arith.constant 0 : i32
    return %arg0, %c0_i32 : i32, i32
  }
  func.func @transform_1(%arg0: i32) -> (i32, i32) {
    %c0_i32 = arith.constant 0 : i32
    %c0_i32_0 = arith.constant 0 : i32
    %c0_i32_1 = arith.constant 0 : i32
    return %c0_i32, %c0_i32_0 : i32, i32
  }
  func.func @transform_2(%arg0: i32) -> (i32, i32) {
    %c0_i32 = arith.constant 0 : i32
    %c0_i32_0 = arith.constant 0 : i32
    %c0_i32_1 = arith.constant 0 : i32
    return %c0_i32, %c0_i32_0 : i32, i32
  }
  func.func @transform_3(%arg0: i32) -> (i32, i32) {
    %c0_i32 = arith.constant 0 : i32
    %c0_i32_0 = arith.constant 0 : i32
    return %arg0, %c0_i32 : i32, i32
  }
}

</mosaic_0001>

<bundles_post_ra>
// kernel: tpu_custom_call.1
= control target key start
LH: loop header
LB: loop body
LE: loop exit
PB: predicated region body
PF: predicated region fallthrough
CT: control target
= control target key end

     0   :  { %8 = vsyncpa [#allocation3], 0  ;;  %s843_s0 = inlined_call_operand.vmem [shape: f32[512,16], index: 0, kind: input, shape index: {}]   ;;  %s844_s1 = inlined_call_operand.vmem [shape: f32[16,128], index: 1, kind: input, shape index: {}]   ;;  %s845_s2 = inlined_call_operand.vmem [shape: f32[1,128], index: 2, kind: input, shape index: {}]   ;;  %s846_s3 = inlined_call_operand.hbm [shape: f32[512,128], index: 3, kind: output, shape index: {}]  }
   0x1   :  { %10 = vsyncpa [#allocation3 + $0x1], 0  ;;  %s693_s12 = smov 0   ;;  %s695_s13 = smov 0  }
   0x2   :  { %s697_s14 = smov 0   ;;  %s699_s15 = smov 0  }
   0x3 LB: > { %s714_s16 = sadd.s32 4294967295, %s668_s15   ;;  %s483_s17 = sadd.s32 4294967294, %s668_s15   ;;  %s668_s15 = sphi %s699_s15, %s852_s15   ;;  %s664_s14 = sphi %s697_s14, %s851_s14   ;;  %s660_s13 = sphi %s695_s13, %s850_s13   ;;  %s656_s12 = sphi %s693_s12, %s849_s12  }
   0x4   : > { %s718_s18 = sadd.s32 1, %s668_s15   ;;  %s91_s19 = sadd.s32 1, %s664_s14 }
   0x5   : > { %s88_s20 = ssub.s32 %s668_s15, %s718_s18  ;;  %p101_p0 = scmp.ne.s32.totalorder %s664_s14, %s660_s13 }
   0x6   : > { %p89_p1 = scmp.eq.s32.totalorder %s88_s20, 0  ;;  %p102_p2 = scmp.eq.s32.totalorder %s714_s16, 3 }
   0x7   : > { %p107_p3 = scmp.ne.s32.totalorder %s660_s13, %s656_s12  ;;  %p108_p4 = scmp.eq.s32.totalorder %s483_s17, 3 }
   0x8   : > { %s729_s21 = scalar_select %p89_p1, %s664_s14, %s91_s19  }
   0x9   : > { %p731_p5 = por %p102_p2, %p101_p0  ;;  %p735_p6 = por %p108_p4, %p107_p3 }
   0xa   : > { %p486_p7 = scmp.ge.s32.totalorder %s668_s15, 1  ;;  %p141_p8 = scmp.lt.s32.totalorder %s668_s15, 5 }
   0xc   : > { %p142_p9 = pnand %p486_p7, %p141_p8 }
   0xd   : > { %v188_v0 = vld [vmem:[%s844_s1] sm:$0xff] (!%p142_p9)  ;;  %v189_v1 = vld [vmem:[%s844_s1 + $0x8] sm:$0xff] (!%p142_p9)  ;;  %s488_s28 = sshll.u32 (!%p142_p9), %s714_s16, 4  ;;  %vm197_vm0 = vcmask (!%p142_p9), 130048   ;;  %s162_s6 = sand.u32 (!%p142_p9), 1, %s660_s13  }
   0xe   : > { %145 = sbr.rel (%p142_p9) target bundleno = 269 (0x10d), region = 32  ;;  %v559_v2 = vpack.c.bf16 (!%p142_p9), %v189_v1, %v188_v0  ;;  %p166_p10 = scmp.lt.s32.totalorder (!%p142_p9), %s488_s28, 63  ;;  %v490_v19 = vld [vmem:[%s845_s2] ss:$0 sm:$0xff] (!%p142_p9) }
   0xf   : > { %s487_s7 = sshll.u32 (!%p142_p9), %s162_s6, 7  ;;  %s512_s11 = sshll.u32 (!%p142_p9), %s714_s16, 11 }
  0x10   : > { %560 = vmatprep.subr.bf16.mxu0 (!%p142_p9), %v559_v2  ;;  %563 = vmatprep.subr.bf16.mxu1 (!%p142_p9), %v559_v2  ;;  %s773_s10 = scalar_lea.vmem (!%p142_p9), [#allocation2], %s487_s7  ;;  %s792_s16 = scalar_lea.hbm (!%p142_p9), %s846_s3, %s512_s11 }
  0x11   : > { %562 = vmatpush3.bf16.msra.mxu0 (!%p142_p9), %v559_v2  ;;  %564 = vmatpush3.bf16.msra.mxu1 (!%p142_p9), %v559_v2  ;;  %s421_s17 = sshll.u32 (!%p142_p9), %s773_s10, 4  ;;  %s802_s24 = scalar_lea.sflag (!%p142_p9), [#allocation3], %s162_s6  ;;  %s794_s17 = int_to_ptr.vmem [resolvable:$true] %s421_s17 }
  0x12   : > { %s606_s25 = scalar_lea.vmem (!%p142_p9), %s794_s17, 2048  ;;  %s670_s26 = smov (!%p142_p9), [#allocation2]  }
  0x13   : > { %p607_p11 = scmp.ne.s32.totalorder (!%p142_p9), %s794_s17, %s606_s25  ;;  %s610_s27 = sshll.u32 (!%p142_p9), %s670_s26, 4  ;;  %s611_s27 = int_to_ptr.vmem [resolvable:$false] %s610_s27 }
  0x14   : > { %p613_p0 = scmp.lt.s32.totalorder (!%p142_p9), %s794_s17, %s611_s27 }
  0x15   : > { %s854_s28 = smov (!%p166_p10, %s488_s28), 63  ;;  %p608_p12 = pnand %p607_p11, %p731_p5 }
  0x16   : > { %s489_s29 = sshll.u32 %s854_s28, 3  ;;  %s612_s28 = scalar_lea.vmem %s611_s27, 4096 }
  0x17   : > { %s169_s5 = scalar_lea.vmem %s843_s0, %s489_s29  ;;  %p609_p13 = pneg %p608_p12 }
  0x18   : > { %v172_v3 = vld [vmem:[%s169_s5] sm:$0xff]  ;;  %v173_v5 = vld [vmem:[%s169_s5 + $0x8] sm:$0xff]  ;;  %v174_v7 = vld [vmem:[%s169_s5 + $0x10] sm:$0xff]  ;;  %p614_p1 = scmp.lt.s32.totalorder %s612_s28, %s606_s25 }
  0x19   : > { %v180_v4 = vld [vmem:[%s169_s5 + $0x40] sm:$0xff]  ;;  %535 = vmatprep.mubr.msk.f32.mxu0 %vm197_vm0, %v172_v3  ;;  %v181_v6 = vld [vmem:[%s169_s5 + $0x48] sm:$0xff]  ;;  %v182_v8 = vld [vmem:[%s169_s5 + $0x50] sm:$0xff] }
  0x1a   : > { %547 = vmatprep.mubr.msk.f32.mxu1 %vm197_vm0, %v180_v4  ;;  %536 = vmatmul.mubr.msk.f32.vlgmr.msra.gmra.mrb[0].mxu0 %vm197_vm0, %v173_v5  ;;  %v175_v9 = vld [vmem:[%s169_s5 + $0x18] sm:$0xff]  ;;  %v176_v11 = vld [vmem:[%s169_s5 + $0x20] sm:$0xff]  ;;  %v177_v13 = vld [vmem:[%s169_s5 + $0x28] sm:$0xff]  ;;  %p615_p2 = por %p614_p1, %p613_p0 }
  0x1b   : > { %548 = vmatmul.mubr.msk.f32.vlgmr.msra.gmra.mrb[0].mxu1 %vm197_vm0, %v181_v6  ;;  %538 = vmatprep.mubr.msk.f32.mxu0 %vm197_vm0, %v174_v7  ;;  %v183_v10 = vld [vmem:[%s169_s5 + $0x58] sm:$0xff]  ;;  %v184_v12 = vld [vmem:[%s169_s5 + $0x60] sm:$0xff]  ;;  %v185_v14 = vld [vmem:[%s169_s5 + $0x68] sm:$0xff] }
  0x1c   : > { %550 = vmatprep.mubr.msk.f32.mxu1 %vm197_vm0, %v182_v8  ;;  %v178_v15 = vld [vmem:[%s169_s5 + $0x30] sm:$0xff]  ;;  %v179_v17 = vld [vmem:[%s169_s5 + $0x38] sm:$0xff]  ;;  %p616_p3 = pnand %p615_p2, %p609_p13 }
  0x1d   : > { %v186_v16 = vld [vmem:[%s169_s5 + $0x70] sm:$0xff]  ;;  %v187_v18 = vld [vmem:[%s169_s5 + $0x78] sm:$0xff] }
  0x1e   : > { %539 = vmatmul.mubr.msk.f32.gmra.mrb[2].mxu0 %vm197_vm0, %v175_v9 }
  0x1f   : > { %551 = vmatmul.mubr.msk.f32.gmra.mrb[2].mxu1 %vm197_vm0, %v183_v10  ;;  %541 = vmatprep.mubr.msk.f32.mxu0 %vm197_vm0, %v176_v11 }
  0x20   : > { %553 = vmatprep.mubr.msk.f32.mxu1 %vm197_vm0, %v184_v12 }
  0x22   : > { %542 = vmatmul.mubr.msk.f32.gmra.mrb[4].mxu0 %vm197_vm0, %v177_v13 }
  0x23   : > { %554 = vmatmul.mubr.msk.f32.gmra.mrb[4].mxu1 %vm197_vm0, %v185_v14  ;;  %544 = vmatprep.mubr.msk.f32.mxu0 %vm197_vm0, %v178_v15 }
  0x24   : > { %556 = vmatprep.mubr.msk.f32.mxu1 %vm197_vm0, %v186_v16 }
  0x26   : > { %545 = vmatmul.mubr.msk.f32.gmra.mrb[6].mxu0 %vm197_vm0, %v179_v17 }
  0x27   : > { %557 = vmatmul.mubr.msk.f32.gmra.mrb[6].mxu1 %vm197_vm0, %v187_v18 }
  0xed   : > { %v537_v20 = vpop.f32.mrb[0].mxu0 }
  0xee   : > { %v549_v21 = vpop.f32.mrb[0].mxu1  ;;  %v318_v22 = vadd.f32 %v537_v20, %v490_v19  ;;  %v312_v24 = vpop.f32.mrb[1].mxu0 }
  0xef   : > { %v358_v23 = vadd.f32 %v549_v21, %v490_v19  ;;  %v352_v25 = vpop.f32.mrb[1].mxu1  ;;  %v313_v26 = vadd.f32 %v490_v19, %v312_v24 }
  0xf0   : > { %v353_v27 = vadd.f32 %v490_v19, %v352_v25  ;;  %392 = vst [vmem:[%s773_s10 + $0x8] sm:$0xff] %v318_v22 }
  0xf1   : > { %400 = vst [vmem:[%s773_s10 + $0x48] sm:$0xff] %v358_v23  ;;  %391 = vst [vmem:[%s773_s10] sm:$0xff] %v313_v26  ;;  %v540_v28 = vpop.f32.mrb[2].mxu0 }
  0xf2   : > { %399 = vst [vmem:[%s773_s10 + $0x40] sm:$0xff] %v353_v27  ;;  %v552_v29 = vpop.f32.mrb[2].mxu1  ;;  %v328_v30 = vadd.f32 %v540_v28, %v490_v19  ;;  %v322_v32 = vpop.f32.mrb[3].mxu0 }
  0xf3   : > { %v368_v31 = vadd.f32 %v552_v29, %v490_v19  ;;  %v362_v33 = vpop.f32.mrb[3].mxu1  ;;  %v323_v34 = vadd.f32 %v490_v19, %v322_v32 }
  0xf4   : > { %v363_v35 = vadd.f32 %v490_v19, %v362_v33  ;;  %394 = vst [vmem:[%s773_s10 + $0x18] sm:$0xff] %v328_v30 }
  0xf5   : > { %402 = vst [vmem:[%s773_s10 + $0x58] sm:$0xff] %v368_v31  ;;  %393 = vst [vmem:[%s773_s10 + $0x10] sm:$0xff] %v323_v34  ;;  %v543_v36 = vpop.f32.mrb[4].mxu0 }
  0xf6   : > { %401 = vst [vmem:[%s773_s10 + $0x50] sm:$0xff] %v363_v35  ;;  %v555_v37 = vpop.f32.mrb[4].mxu1  ;;  %v338_v38 = vadd.f32 %v543_v36, %v490_v19  ;;  %v332_v40 = vpop.f32.mrb[5].mxu0 }
  0xf7   : > { %v378_v39 = vadd.f32 %v555_v37, %v490_v19  ;;  %v372_v41 = vpop.f32.mrb[5].mxu1  ;;  %v333_v42 = vadd.f32 %v490_v19, %v332_v40 }
  0xf8   : > { %v373_v43 = vadd.f32 %v490_v19, %v372_v41  ;;  %396 = vst [vmem:[%s773_s10 + $0x28] sm:$0xff] %v338_v38 }
  0xf9   : > { %404 = vst [vmem:[%s773_s10 + $0x68] sm:$0xff] %v378_v39  ;;  %395 = vst [vmem:[%s773_s10 + $0x20] sm:$0xff] %v333_v42  ;;  %v546_v44 = vpop.f32.mrb[6].mxu0 }
  0xfa   : > { %403 = vst [vmem:[%s773_s10 + $0x60] sm:$0xff] %v373_v43  ;;  %v558_v45 = vpop.f32.mrb[6].mxu1  ;;  %v348_v46 = vadd.f32 %v546_v44, %v490_v19  ;;  %v342_v48 = vpop.f32.mrb[7].mxu0 }
  0xfb   : > { %v388_v47 = vadd.f32 %v558_v45, %v490_v19  ;;  %v382_v49 = vpop.f32.mrb[7].mxu1  ;;  %v343_v50 = vadd.f32 %v490_v19, %v342_v48 }
  0xfc   : > { %v383_v51 = vadd.f32 %v490_v19, %v382_v49  ;;  %398 = vst [vmem:[%s773_s10 + $0x38] sm:$0xff] %v348_v46 }
  0xfd   : > { %406 = vst [vmem:[%s773_s10 + $0x78] sm:$0xff] %v388_v47  ;;  %397 = vst [vmem:[%s773_s10 + $0x30] sm:$0xff] %v343_v50 }
  0xfe   : > { %405 = vst [vmem:[%s773_s10 + $0x70] sm:$0xff] %v383_v51 }
  0xff   : > { %619 = shalt.err (!%p616_p3)
}
 0x100   : > { %s620_s29 = scalar_lea.hbm %s792_s16, 2048  ;;  %s624_s5 = scalar_lea.hbm %s846_s3, 8192 }
 0x101   : > { %p621_p4 = scmp.ne.s32.totalorder %s792_s16, %s620_s29  ;;  %p625_p9 = scmp.lt.u32.totalorder %s792_s16, %s846_s3 }
 0x102   : > { %p626_p10 = scmp.lt.u32.totalorder %s624_s5, %s620_s29  ;;  %p628_p12 = scmp.lt.u32.totalorder %s620_s29, %s792_s16 }
 0x103   : > { %p622_p7 = pnand %p621_p4, %p731_p5 }
 0x104   : > { %p627_p11 = por %p626_p10, %p625_p9 }
 0x105   : > { %p623_p8 = pneg %p622_p7 }
 0x106   : > { %p629_p13 = por %p628_p12, %p627_p11 }
 0x108   : > { %p630_p0 = pnand %p629_p13, %p623_p8 }
 0x10a   : > { %633 = shalt.err (!%p630_p0)
}
 0x10b   : > { %s671_s8 = smov 128   ;;  %s672_s9 = smov 8  }
 0x10c   : > { %565 = dma.vmem_to_hbm [thread:$0]  (%p731_p5), %s794_s17, 2048, %s792_s16, %s802_s24, %s671_s8, %s671_s8, %s672_s9  }
 0x10d PF: > { %p571_p1 = scmp.ge.s32.totalorder %s668_s15, 2  ;;  %s436_s10 = sand.u32 1, %s656_s12  }
 0x10e   : > { %s437_s11 = scalar_lea.sflag [#allocation3], %s436_s10 }
 0x10f   : > { %p568_p2 = pnand %p571_p1, %p735_p6 }
 0x111   : > { %651 = dma.done.wait (!%p568_p2), %s437_s11, 2048  }
 0x112   : > { %653 = vsyncadd (!%p568_p2), %s437_s11, 4294965248  ;;  %p13_p3 = scmp.ge.s32.totalorder %s718_s18, 6   ;;  %s849_s12 = smov %s660_s13 }
 0x113   : > { %s850_s13 = smov %s664_s14  ;;  %s851_s14 = smov %s729_s21 }
 0x114   : > { %s852_s15 = smov %s718_s18  ;;  %15 = sbr.rel (!%p13_p3) target bundleno = 3 (0x3), region = 67 }
 0x11b   :  { %442 = vsyncpa [#allocation3], 1 }
 0x11c   :  { %444 = vsyncpa [#allocation3 + $0x1], 1 }

</bundles_post_ra>
